<compile_context>
chip_gen: v7x
topology: tpu7x:2x2x1
jax: 0.10.0
libtpu: 0.0.40
codegen_flags: <defaults>
</compile_context>

<pallas_src>
import math

import jax
import jax.numpy as jnp
from jax.experimental import pallas as pl
from jax.experimental.pallas import tpu as pltpu

_LN_EPS = 1e-12


def _gelu_exact(x):
    # Matches the PyTorch reference: x * 0.5 * (1 + erf(x / sqrt(2)))
    return x * 0.5 * (1.0 + jax.lax.erf(x * (1.0 / math.sqrt(2.0))))


def _round_up(x, m):
    return ((x + m - 1) // m) * m


def dep_head_kernel(child_ref, head_ref,
                    wc_ref, bc_ref, wh_ref, bh_ref,
                    gc_ref, gh_ref, gp_ref,
                    bec_ref, beh_ref, bep_ref,
                    wdc_ref, wdh_ref, wdp_ref, dbias_ref,
                    out_ref):
    # Two (TM,H) @ (H,H3) projections on the MXU (f32 accumulation) + exact-erf GELU.
    c = _gelu_exact(
        jnp.dot(child_ref[...], wc_ref[...], preferred_element_type=jnp.float32)
        + bc_ref[...])
    h = _gelu_exact(
        jnp.dot(head_ref[...], wh_ref[...], preferred_element_type=jnp.float32)
        + bh_ref[...])
    p = c * h  # the "child.mul(head)" third block of the concatenation

    # LayerNorm over the *virtual* concat [c, h, p] of width H = 3*H3, computed
    # blockwise so the lane-axis concatenate (and its relayout + extra (TM,H)
    # buffer) never materializes.
    h3 = c.shape[-1]
    inv_h = 1.0 / (3.0 * h3)
    mean = (jnp.sum(c, axis=-1, keepdims=True)
            + jnp.sum(h, axis=-1, keepdims=True)
            + jnp.sum(p, axis=-1, keepdims=True)) * inv_h
    dc = c - mean
    dh = h - mean
    dp = p - mean
    var = (jnp.sum(dc * dc, axis=-1, keepdims=True)
           + jnp.sum(dh * dh, axis=-1, keepdims=True)
           + jnp.sum(dp * dp, axis=-1, keepdims=True)) * inv_h
    rstd = jax.lax.rsqrt(var + _LN_EPS)  # EUP op, no VPU divide

    nc = dc * rstd * gc_ref[...] + bec_ref[...]
    nh = dh * rstd * gh_ref[...] + beh_ref[...]
    nq = dp * rstd * gp_ref[...] + bep_ref[...]

    # Decoder as three K-blocks against the lane-padded (H3, R_PAD=128) weights.
    wd_dt = wdc_ref.dtype
    logits = (jnp.dot(nc.astype(wd_dt), wdc_ref[...], preferred_element_type=jnp.float32)
              + jnp.dot(nh.astype(wd_dt), wdh_ref[...], preferred_element_type=jnp.float32)
              + jnp.dot(nq.astype(wd_dt), wdp_ref[...], preferred_element_type=jnp.float32))
    out_ref[...] = (logits + dbias_ref[...]).astype(out_ref.dtype)


def bert_dep_prediction_head(child_hidden, head_hidden, params, *,
                             tile_m=512, matmul_dtype=None):
    """child_hidden, head_hidden: (B, S, H) float32. Returns (B, S, 47) float32.

    matmul_dtype: pass jnp.bfloat16 on v6e/v7x to feed the MXU at native bf16 rate
    (accumulation and all elementwise math remain f32). Default keeps f32 inputs.
    """
    B, S, H = child_hidden.shape
    assert H % 3 == 0, "hidden_size must be divisible by 3"
    H3 = H // 3
    R = params["wd_t"].shape[1]
    R_PAD = _round_up(max(R, 128), 128)  # lane-dense output / full MXU columns

    M = B * S
    TM = min(tile_m, _round_up(M, 8))
    num_tiles = pl.cdiv(M, TM)
    M_pad = num_tiles * TM

    mm_dt = matmul_dtype if matmul_dtype is not None else jnp.float32

    child2 = child_hidden.reshape(M, H)
    head2 = head_hidden.reshape(M, H)
    if M_pad != M:
        child2 = jnp.pad(child2, ((0, M_pad - M), (0, 0)))
        head2 = jnp.pad(head2, ((0, M_pad - M), (0, 0)))
    child2 = child2.astype(mm_dt)
    head2 = head2.astype(mm_dt)

    wc_t = params["wc_t"].astype(mm_dt)
    wh_t = params["wh_t"].astype(mm_dt)
    bc = params["bc"].reshape(1, H3).astype(jnp.float32)
    bh = params["bh"].reshape(1, H3).astype(jnp.float32)

    gamma = params["gamma"].reshape(1, H).astype(jnp.float32)
    beta = params["beta"].reshape(1, H).astype(jnp.float32)
    gc, gh, gp = gamma[:, :H3], gamma[:, H3:2 * H3], gamma[:, 2 * H3:]
    bec, beh, bep = beta[:, :H3], beta[:, H3:2 * H3], beta[:, 2 * H3:]

    # Zero-pad the decoder weight/bias to R_PAD lanes; split into the 3 K-blocks.
    wd_pad = jnp.zeros((H, R_PAD), mm_dt).at[:, :R].set(params["wd_t"].astype(mm_dt))
    wd_c, wd_h, wd_p = wd_pad[:H3], wd_pad[H3:2 * H3], wd_pad[2 * H3:]
    dbias = jnp.zeros((1, R_PAD), jnp.float32).at[:, :R].set(
        params["dec_bias"].reshape(1, R).astype(jnp.float32))

    row_spec = pl.BlockSpec((TM, H), lambda i: (i, 0))

    def resident(shape):
        # Full-shape block, constant index_map -> stays VMEM-resident across steps.
        return pl.BlockSpec(shape, lambda i: (0, 0))

    f32b = jnp.dtype(jnp.float32).itemsize
    mmb = jnp.dtype(mm_dt).itemsize
    weights_bytes = mmb * (2 * H * H3 + 3 * H3 * R_PAD) + f32b * (6 * H3 + R_PAD + 2 * H3)
    act_bytes = 2 * (2 * mmb * TM * H + f32b * TM * R_PAD)   # double-buffered in/out
    scratch_bytes = f32b * 10 * TM * H3                      # c,h,p + centered + normed
    vmem_limit = int(min(64 * 1024 * 1024,
                         max(32 * 1024 * 1024,
                             2 * (weights_bytes + act_bytes + scratch_bytes))))

    cost = pl.CostEstimate(
        flops=2 * M_pad * (2 * H * H3 + H * R_PAD),
        transcendentals=M_pad * (2 * H3 + 1),
        bytes_accessed=2 * mmb * M_pad * H + f32b * M_pad * R_PAD + weights_bytes,
    )

    out = pl.pallas_call(
        dep_head_kernel,
        out_shape=jax.ShapeDtypeStruct((M_pad, R_PAD), jnp.float32),
        grid=(num_tiles,),
        in_specs=[
            row_spec, row_spec,
            resident((H, H3)), resident((1, H3)),
            resident((H, H3)), resident((1, H3)),
            resident((1, H3)), resident((1, H3)), resident((1, H3)),
            resident((1, H3)), resident((1, H3)), resident((1, H3)),
            resident((H3, R_PAD)), resident((H3, R_PAD)), resident((H3, R_PAD)),
            resident((1, R_PAD)),
        ],
        out_specs=pl.BlockSpec((TM, R_PAD), lambda i: (i, 0)),
        compiler_params=pltpu.CompilerParams(
            dimension_semantics=("parallel",),
            vmem_limit_bytes=vmem_limit),
        cost_estimate=cost,
    )(child2, head2,
      wc_t, bc, wh_t, bh,
      gc, gh, gp, bec, beh, bep,
      wd_c, wd_h, wd_p, dbias)

    return out[:M, :R].reshape(B, S, R)


def _reference(child_hidden, head_hidden, params):
    # Pure-JAX reference of the same math (with the explicit concatenate).
    c = _gelu_exact(child_hidden @ params["wc_t"] + params["bc"][0])
    h = _gelu_exact(head_hidden @ params["wh_t"] + params["bh"][0])
    hidden = jnp.concatenate([c, h, c * h], axis=-1)
    mean = jnp.mean(hidden, axis=-1, keepdims=True)
    var = jnp.mean((hidden - mean) ** 2, axis=-1, keepdims=True)
    normed = (hidden - mean) / jnp.sqrt(var + _LN_EPS)
    normed = normed * params["gamma"][0] + params["beta"][0]
    return normed @ params["wd_t"] + params["dec_bias"][0]


if __name__ == "__main__":
    # Small shapes consistent with the module: hidden_size must be divisible by 3.
    B, S, H = 2, 8, 96
    H3 = H // 3
    R = 47  # relation_number

    key = jax.random.PRNGKey(0)
    k = jax.random.split(key, 9)

    child_hidden = jax.random.normal(k[0], (B, S, H), jnp.float32)
    head_hidden = jax.random.normal(k[1], (B, S, H), jnp.float32)

    params = {
        # nn.Linear(H, H//3): weight (H3, H) -> stored transposed as (H, H3)
        "wc_t": 0.02 * jax.random.normal(k[2], (H, H3), jnp.float32),
        "bc": 0.02 * jax.random.normal(k[3], (1, H3), jnp.float32),
        "wh_t": 0.02 * jax.random.normal(k[4], (H, H3), jnp.float32),
        "bh": 0.02 * jax.random.normal(k[5], (1, H3), jnp.float32),
        # BertLayerNorm(H)
        "gamma": jnp.ones((1, H), jnp.float32),
        "beta": jnp.zeros((1, H), jnp.float32),
        # nn.Linear(H, 47, bias=False) -> transposed (H, 47); extra bias parameter (47,)
        "wd_t": 0.02 * jax.random.normal(k[6], (H, R), jnp.float32),
        "dec_bias": jnp.zeros((1, R), jnp.float32),
    }

    out = bert_dep_prediction_head(child_hidden, head_hidden, params)
    jax.block_until_ready(out)
    ref = _reference(child_hidden, head_hidden, params)
    assert out.shape == (B, S, R)
    assert jnp.allclose(out, ref, rtol=1e-4, atol=1e-4)

    # Second check: M not a multiple of the tile -> exercises row padding, the
    # multi-step pipelined grid, and the out-of-kernel slice of the padded output.
    B2, S2 = 3, 7
    c2 = jax.random.normal(k[7], (B2, S2, H), jnp.float32)
    h2 = jax.random.normal(k[8], (B2, S2, H), jnp.float32)
    out2 = bert_dep_prediction_head(c2, h2, params, tile_m=8)
    jax.block_until_ready(out2)
    ref2 = _reference(c2, h2, params)
    assert out2.shape == (B2, S2, R)
    assert jnp.allclose(out2, ref2, rtol=1e-4, atol=1e-4)

    print("KERNEL_OK")
</pallas_src>

<mosaic_0001>
module attributes {stable_mosaic.version = 11 : i64} {
  func.func @dep_head_kernel(%arg0: i32, %arg1: memref<16x96xf32, #tpu.memory_space<vmem>>, %arg2: memref<16x96xf32, #tpu.memory_space<vmem>>, %arg3: memref<96x32xf32, #tpu.memory_space<vmem>>, %arg4: memref<1x32xf32, #tpu.memory_space<vmem>>, %arg5: memref<96x32xf32, #tpu.memory_space<vmem>>, %arg6: memref<1x32xf32, #tpu.memory_space<vmem>>, %arg7: memref<1x32xf32, #tpu.memory_space<vmem>>, %arg8: memref<1x32xf32, #tpu.memory_space<vmem>>, %arg9: memref<1x32xf32, #tpu.memory_space<vmem>>, %arg10: memref<1x32xf32, #tpu.memory_space<vmem>>, %arg11: memref<1x32xf32, #tpu.memory_space<vmem>>, %arg12: memref<1x32xf32, #tpu.memory_space<vmem>>, %arg13: memref<32x128xf32, #tpu.memory_space<vmem>>, %arg14: memref<32x128xf32, #tpu.memory_space<vmem>>, %arg15: memref<32x128xf32, #tpu.memory_space<vmem>>, %arg16: memref<1x128xf32, #tpu.memory_space<vmem>>, %arg17: memref<16x128xf32, #tpu.memory_space<vmem>>) attributes {dimension_semantics = [#tpu.dimension_semantics<parallel>], iteration_bounds = array<i64: 1>, scalar_prefetch = 0 : i64, scratch_operands = 0 : i64, tpu.core_type = #tpu.core_type<tc>, window_params = [{transform_indices = @transform_0, window_bounds = array<i64: 16, 96>}, {transform_indices = @transform_1, window_bounds = array<i64: 16, 96>}, {pipeline_mode = #tpu.pipeline_mode<synchronous>, transform_indices = @transform_2, window_bounds = array<i64: 96, 32>}, {pipeline_mode = #tpu.pipeline_mode<synchronous>, transform_indices = @transform_3, window_bounds = array<i64: 1, 32>}, {pipeline_mode = #tpu.pipeline_mode<synchronous>, transform_indices = @transform_4, window_bounds = array<i64: 96, 32>}, {pipeline_mode = #tpu.pipeline_mode<synchronous>, transform_indices = @transform_5, window_bounds = array<i64: 1, 32>}, {pipeline_mode = #tpu.pipeline_mode<synchronous>, transform_indices = @transform_6, window_bounds = array<i64: 1, 32>}, {pipeline_mode = #tpu.pipeline_mode<synchronous>, transform_indices = @transform_7, window_bounds = array<i64: 1, 32>}, {pipeline_mode = #tpu.pipeline_mode<synchronous>, transform_indices = @transform_8, window_bounds = array<i64: 1, 32>}, {pipeline_mode = #tpu.pipeline_mode<synchronous>, transform_indices = @transform_9, window_bounds = array<i64: 1, 32>}, {pipeline_mode = #tpu.pipeline_mode<synchronous>, transform_indices = @transform_10, window_bounds = array<i64: 1, 32>}, {pipeline_mode = #tpu.pipeline_mode<synchronous>, transform_indices = @transform_11, window_bounds = array<i64: 1, 32>}, {pipeline_mode = #tpu.pipeline_mode<synchronous>, transform_indices = @transform_12, window_bounds = array<i64: 32, 128>}, {pipeline_mode = #tpu.pipeline_mode<synchronous>, transform_indices = @transform_13, window_bounds = array<i64: 32, 128>}, {pipeline_mode = #tpu.pipeline_mode<synchronous>, transform_indices = @transform_14, window_bounds = array<i64: 32, 128>}, {pipeline_mode = #tpu.pipeline_mode<synchronous>, transform_indices = @transform_15, window_bounds = array<i64: 1, 128>}, {transform_indices = @transform_16, window_bounds = array<i64: 16, 128>}]} {
    %c0 = arith.constant 0 : index
    %c0_0 = arith.constant 0 : index
    %0 = vector.load %arg1[%c0, %c0_0] : memref<16x96xf32, #tpu.memory_space<vmem>>, vector<16x96xf32>
    %c0_1 = arith.constant 0 : index
    %c0_2 = arith.constant 0 : index
    %1 = vector.load %arg3[%c0_1, %c0_2] : memref<96x32xf32, #tpu.memory_space<vmem>>, vector<96x32xf32>
    %cst = arith.constant dense<0.000000e+00> : vector<16x32xf32>
    %2 = tpu.matmul %0, %1, %cst {dimension_numbers = #tpu.dot_dimension_numbers<[1], [0], [0], [1], [0, 0, 1, 1], [], []>} : vector<16x96xf32>, vector<96x32xf32>, vector<16x32xf32> -> vector<16x32xf32>
    %c0_3 = arith.constant 0 : index
    %c0_4 = arith.constant 0 : index
    %3 = vector.load %arg4[%c0_3, %c0_4] : memref<1x32xf32, #tpu.memory_space<vmem>>, vector<1x32xf32>
    %4 = vector.broadcast %3 : vector<1x32xf32> to vector<16x32xf32>
    %5 = arith.addf %2, %4 : vector<16x32xf32>
    %cst_5 = arith.constant 5.000000e-01 : f32
    %6 = vector.broadcast %cst_5 : f32 to vector<16x32xf32>
    %7 = arith.mulf %5, %6 : vector<16x32xf32>
    %cst_6 = arith.constant 0.707106769 : f32
    %8 = vector.broadcast %cst_6 : f32 to vector<16x32xf32>
    %9 = arith.mulf %5, %8 : vector<16x32xf32>
    %10 = math.erf %9 : vector<16x32xf32>
    %cst_7 = arith.constant 1.000000e+00 : f32
    %11 = vector.broadcast %cst_7 : f32 to vector<16x32xf32>
    %12 = arith.addf %11, %10 : vector<16x32xf32>
    %13 = arith.mulf %7, %12 : vector<16x32xf32>
    %c0_8 = arith.constant 0 : index
    %c0_9 = arith.constant 0 : index
    %14 = vector.load %arg2[%c0_8, %c0_9] : memref<16x96xf32, #tpu.memory_space<vmem>>, vector<16x96xf32>
    %c0_10 = arith.constant 0 : index
    %c0_11 = arith.constant 0 : index
    %15 = vector.load %arg5[%c0_10, %c0_11] : memref<96x32xf32, #tpu.memory_space<vmem>>, vector<96x32xf32>
    %cst_12 = arith.constant dense<0.000000e+00> : vector<16x32xf32>
    %16 = tpu.matmul %14, %15, %cst_12 {dimension_numbers = #tpu.dot_dimension_numbers<[1], [0], [0], [1], [0, 0, 1, 1], [], []>} : vector<16x96xf32>, vector<96x32xf32>, vector<16x32xf32> -> vector<16x32xf32>
    %c0_13 = arith.constant 0 : index
    %c0_14 = arith.constant 0 : index
    %17 = vector.load %arg6[%c0_13, %c0_14] : memref<1x32xf32, #tpu.memory_space<vmem>>, vector<1x32xf32>
    %18 = vector.broadcast %17 : vector<1x32xf32> to vector<16x32xf32>
    %19 = arith.addf %16, %18 : vector<16x32xf32>
    %cst_15 = arith.constant 5.000000e-01 : f32
    %20 = vector.broadcast %cst_15 : f32 to vector<16x32xf32>
    %21 = arith.mulf %19, %20 : vector<16x32xf32>
    %cst_16 = arith.constant 0.707106769 : f32
    %22 = vector.broadcast %cst_16 : f32 to vector<16x32xf32>
    %23 = arith.mulf %19, %22 : vector<16x32xf32>
    %24 = math.erf %23 : vector<16x32xf32>
    %cst_17 = arith.constant 1.000000e+00 : f32
    %25 = vector.broadcast %cst_17 : f32 to vector<16x32xf32>
    %26 = arith.addf %25, %24 : vector<16x32xf32>
    %27 = arith.mulf %21, %26 : vector<16x32xf32>
    %28 = arith.mulf %13, %27 : vector<16x32xf32>
    %cst_18 = arith.constant dense<0.000000e+00> : vector<16xf32>
    %29 = vector.multi_reduction <add>, %13, %cst_18 [1] : vector<16x32xf32> to vector<16xf32>
    %30 = vector.shape_cast %29 : vector<16xf32> to vector<16x1xf32>
    %cst_19 = arith.constant dense<0.000000e+00> : vector<16xf32>
    %31 = vector.multi_reduction <add>, %27, %cst_19 [1] : vector<16x32xf32> to vector<16xf32>
    %32 = vector.shape_cast %31 : vector<16xf32> to vector<16x1xf32>
    %33 = arith.addf %30, %32 : vector<16x1xf32>
    %cst_20 = arith.constant dense<0.000000e+00> : vector<16xf32>
    %34 = vector.multi_reduction <add>, %28, %cst_20 [1] : vector<16x32xf32> to vector<16xf32>
    %35 = vector.shape_cast %34 : vector<16xf32> to vector<16x1xf32>
    %36 = arith.addf %33, %35 : vector<16x1xf32>
    %cst_21 = arith.constant 0.010416667 : f32
    %37 = vector.broadcast %cst_21 : f32 to vector<16x1xf32>
    %38 = arith.mulf %36, %37 : vector<16x1xf32>
    %39 = vector.broadcast %38 : vector<16x1xf32> to vector<16x32xf32>
    %40 = arith.subf %13, %39 : vector<16x32xf32>
    %41 = vector.broadcast %38 : vector<16x1xf32> to vector<16x32xf32>
    %42 = arith.subf %27, %41 : vector<16x32xf32>
    %43 = vector.broadcast %38 : vector<16x1xf32> to vector<16x32xf32>
    %44 = arith.subf %28, %43 : vector<16x32xf32>
    %45 = arith.mulf %40, %40 : vector<16x32xf32>
    %cst_22 = arith.constant dense<0.000000e+00> : vector<16xf32>
    %46 = vector.multi_reduction <add>, %45, %cst_22 [1] : vector<16x32xf32> to vector<16xf32>
    %47 = vector.shape_cast %46 : vector<16xf32> to vector<16x1xf32>
    %48 = arith.mulf %42, %42 : vector<16x32xf32>
    %cst_23 = arith.constant dense<0.000000e+00> : vector<16xf32>
    %49 = vector.multi_reduction <add>, %48, %cst_23 [1] : vector<16x32xf32> to vector<16xf32>
    %50 = vector.shape_cast %49 : vector<16xf32> to vector<16x1xf32>
    %51 = arith.addf %47, %50 : vector<16x1xf32>
    %52 = arith.mulf %44, %44 : vector<16x32xf32>
    %cst_24 = arith.constant dense<0.000000e+00> : vector<16xf32>
    %53 = vector.multi_reduction <add>, %52, %cst_24 [1] : vector<16x32xf32> to vector<16xf32>
    %54 = vector.shape_cast %53 : vector<16xf32> to vector<16x1xf32>
    %55 = arith.addf %51, %54 : vector<16x1xf32>
    %cst_25 = arith.constant 0.010416667 : f32
    %56 = vector.broadcast %cst_25 : f32 to vector<16x1xf32>
    %57 = arith.mulf %55, %56 : vector<16x1xf32>
    %cst_26 = arith.constant 9.99999996E-13 : f32
    %58 = vector.broadcast %cst_26 : f32 to vector<16x1xf32>
    %59 = arith.addf %57, %58 : vector<16x1xf32>
    %60 = math.rsqrt %59 : vector<16x1xf32>
    %61 = vector.broadcast %60 : vector<16x1xf32> to vector<16x32xf32>
    %62 = arith.mulf %40, %61 : vector<16x32xf32>
    %c0_27 = arith.constant 0 : index
    %c0_28 = arith.constant 0 : index
    %63 = vector.load %arg7[%c0_27, %c0_28] : memref<1x32xf32, #tpu.memory_space<vmem>>, vector<1x32xf32>
    %64 = vector.broadcast %63 : vector<1x32xf32> to vector<16x32xf32>
    %65 = arith.mulf %62, %64 : vector<16x32xf32>
    %c0_29 = arith.constant 0 : index
    %c0_30 = arith.constant 0 : index
    %66 = vector.load %arg10[%c0_29, %c0_30] : memref<1x32xf32, #tpu.memory_space<vmem>>, vector<1x32xf32>
    %67 = vector.broadcast %66 : vector<1x32xf32> to vector<16x32xf32>
    %68 = arith.addf %65, %67 : vector<16x32xf32>
    %69 = vector.broadcast %60 : vector<16x1xf32> to vector<16x32xf32>
    %70 = arith.mulf %42, %69 : vector<16x32xf32>
    %c0_31 = arith.constant 0 : index
    %c0_32 = arith.constant 0 : index
    %71 = vector.load %arg8[%c0_31, %c0_32] : memref<1x32xf32, #tpu.memory_space<vmem>>, vector<1x32xf32>
    %72 = vector.broadcast %71 : vector<1x32xf32> to vector<16x32xf32>
    %73 = arith.mulf %70, %72 : vector<16x32xf32>
    %c0_33 = arith.constant 0 : index
    %c0_34 = arith.constant 0 : index
    %74 = vector.load %arg11[%c0_33, %c0_34] : memref<1x32xf32, #tpu.memory_space<vmem>>, vector<1x32xf32>
    %75 = vector.broadcast %74 : vector<1x32xf32> to vector<16x32xf32>
    %76 = arith.addf %73, %75 : vector<16x32xf32>
    %77 = vector.broadcast %60 : vector<16x1xf32> to vector<16x32xf32>
    %78 = arith.mulf %44, %77 : vector<16x32xf32>
    %c0_35 = arith.constant 0 : index
    %c0_36 = arith.constant 0 : index
    %79 = vector.load %arg9[%c0_35, %c0_36] : memref<1x32xf32, #tpu.memory_space<vmem>>, vector<1x32xf32>
    %80 = vector.broadcast %79 : vector<1x32xf32> to vector<16x32xf32>
    %81 = arith.mulf %78, %80 : vector<16x32xf32>
    %c0_37 = arith.constant 0 : index
    %c0_38 = arith.constant 0 : index
    %82 = vector.load %arg12[%c0_37, %c0_38] : memref<1x32xf32, #tpu.memory_space<vmem>>, vector<1x32xf32>
    %83 = vector.broadcast %82 : vector<1x32xf32> to vector<16x32xf32>
    %84 = arith.addf %81, %83 : vector<16x32xf32>
    %c0_39 = arith.constant 0 : index
    %c0_40 = arith.constant 0 : index
    %85 = vector.load %arg13[%c0_39, %c0_40] : memref<32x128xf32, #tpu.memory_space<vmem>>, vector<32x128xf32>
    %cst_41 = arith.constant dense<0.000000e+00> : vector<16x128xf32>
    %86 = tpu.matmul %68, %85, %cst_41 {dimension_numbers = #tpu.dot_dimension_numbers<[1], [0], [0], [1], [0, 0, 1, 1], [], []>} : vector<16x32xf32>, vector<32x128xf32>, vector<16x128xf32> -> vector<16x128xf32>
    %c0_42 = arith.constant 0 : index
    %c0_43 = arith.constant 0 : index
    %87 = vector.load %arg14[%c0_42, %c0_43] : memref<32x128xf32, #tpu.memory_space<vmem>>, vector<32x128xf32>
    %cst_44 = arith.constant dense<0.000000e+00> : vector<16x128xf32>
    %88 = tpu.matmul %76, %87, %cst_44 {dimension_numbers = #tpu.dot_dimension_numbers<[1], [0], [0], [1], [0, 0, 1, 1], [], []>} : vector<16x32xf32>, vector<32x128xf32>, vector<16x128xf32> -> vector<16x128xf32>
    %89 = arith.addf %86, %88 : vector<16x128xf32>
    %c0_45 = arith.constant 0 : index
    %c0_46 = arith.constant 0 : index
    %90 = vector.load %arg15[%c0_45, %c0_46] : memref<32x128xf32, #tpu.memory_space<vmem>>, vector<32x128xf32>
    %cst_47 = arith.constant dense<0.000000e+00> : vector<16x128xf32>
    %91 = tpu.matmul %84, %90, %cst_47 {dimension_numbers = #tpu.dot_dimension_numbers<[1], [0], [0], [1], [0, 0, 1, 1], [], []>} : vector<16x32xf32>, vector<32x128xf32>, vector<16x128xf32> -> vector<16x128xf32>
    %92 = arith.addf %89, %91 : vector<16x128xf32>
    %c0_48 = arith.constant 0 : index
    %c0_49 = arith.constant 0 : index
    %93 = vector.load %arg16[%c0_48, %c0_49] : memref<1x128xf32, #tpu.memory_space<vmem>>, vector<1x128xf32>
    %94 = vector.broadcast %93 : vector<1x128xf32> to vector<16x128xf32>
    %95 = arith.addf %92, %94 : vector<16x128xf32>
    %c0_50 = arith.constant 0 : index
    %c0_51 = arith.constant 0 : index
    %96 = vector.load %arg17[%c0_50, %c0_51] : memref<16x128xf32, #tpu.memory_space<vmem>>, vector<16x128xf32>
    tpu.vector_store %arg17[%c0_50, %c0_51], %95 {strides = array<i32>} : memref<16x128xf32, #tpu.memory_space<vmem>>, vector<16x128xf32>,
    return
  }
  func.func @transform_0(%arg0: i32) -> (i32, i32) {
    %c0_i32 = arith.constant 0 : i32
    %c0_i32_0 = arith.constant 0 : i32
    return %arg0, %c0_i32 : i32, i32
  }
  func.func @transform_1(%arg0: i32) -> (i32, i32) {
    %c0_i32 = arith.constant 0 : i32
    %c0_i32_0 = arith.constant 0 : i32
    return %arg0, %c0_i32 : i32, i32
  }
  func.func @transform_2(%arg0: i32) -> (i32, i32) {
    %c0_i32 = arith.constant 0 : i32
    %c0_i32_0 = arith.constant 0 : i32
    %c0_i32_1 = arith.constant 0 : i32
    return %c0_i32, %c0_i32_0 : i32, i32
  }
  func.func @transform_3(%arg0: i32) -> (i32, i32) {
    %c0_i32 = arith.constant 0 : i32
    %c0_i32_0 = arith.constant 0 : i32
    %c0_i32_1 = arith.constant 0 : i32
    return %c0_i32, %c0_i32_0 : i32, i32
  }
  func.func @transform_4(%arg0: i32) -> (i32, i32) {
    %c0_i32 = arith.constant 0 : i32
    %c0_i32_0 = arith.constant 0 : i32
    %c0_i32_1 = arith.constant 0 : i32
    return %c0_i32, %c0_i32_0 : i32, i32
  }
  func.func @transform_5(%arg0: i32) -> (i32, i32) {
    %c0_i32 = arith.constant 0 : i32
    %c0_i32_0 = arith.constant 0 : i32
    %c0_i32_1 = arith.constant 0 : i32
    return %c0_i32, %c0_i32_0 : i32, i32
  }
  func.func @transform_6(%arg0: i32) -> (i32, i32) {
    %c0_i32 = arith.constant 0 : i32
    %c0_i32_0 = arith.constant 0 : i32
    %c0_i32_1 = arith.constant 0 : i32
    return %c0_i32, %c0_i32_0 : i32, i32
  }
  func.func @transform_7(%arg0: i32) -> (i32, i32) {
    %c0_i32 = arith.constant 0 : i32
    %c0_i32_0 = arith.constant 0 : i32
    %c0_i32_1 = arith.constant 0 : i32
    return %c0_i32, %c0_i32_0 : i32, i32
  }
  func.func @transform_8(%arg0: i32) -> (i32, i32) {
    %c0_i32 = arith.constant 0 : i32
    %c0_i32_0 = arith.constant 0 : i32
    %c0_i32_1 = arith.constant 0 : i32
    return %c0_i32, %c0_i32_0 : i32, i32
  }
  func.func @transform_9(%arg0: i32) -> (i32, i32) {
    %c0_i32 = arith.constant 0 : i32
    %c0_i32_0 = arith.constant 0 : i32
    %c0_i32_1 = arith.constant 0 : i32
    return %c0_i32, %c0_i32_0 : i32, i32
  }
  func.func @transform_10(%arg0: i32) -> (i32, i32) {
    %c0_i32 = arith.constant 0 : i32
    %c0_i32_0 = arith.constant 0 : i32
    %c0_i32_1 = arith.constant 0 : i32
    return %c0_i32, %c0_i32_0 : i32, i32
  }
  func.func @transform_11(%arg0: i32) -> (i32, i32) {
    %c0_i32 = arith.constant 0 : i32
    %c0_i32_0 = arith.constant 0 : i32
    %c0_i32_1 = arith.constant 0 : i32
    return %c0_i32, %c0_i32_0 : i32, i32
  }
  func.func @transform_12(%arg0: i32) -> (i32, i32) {
    %c0_i32 = arith.constant 0 : i32
    %c0_i32_0 = arith.constant 0 : i32
    %c0_i32_1 = arith.constant 0 : i32
    return %c0_i32, %c0_i32_0 : i32, i32
  }
  func.func @transform_13(%arg0: i32) -> (i32, i32) {
    %c0_i32 = arith.constant 0 : i32
    %c0_i32_0 = arith.constant 0 : i32
    %c0_i32_1 = arith.constant 0 : i32
    return %c0_i32, %c0_i32_0 : i32, i32
  }
  func.func @transform_14(%arg0: i32) -> (i32, i32) {
    %c0_i32 = arith.constant 0 : i32
    %c0_i32_0 = arith.constant 0 : i32
    %c0_i32_1 = arith.constant 0 : i32
    return %c0_i32, %c0_i32_0 : i32, i32
  }
  func.func @transform_15(%arg0: i32) -> (i32, i32) {
    %c0_i32 = arith.constant 0 : i32
    %c0_i32_0 = arith.constant 0 : i32
    %c0_i32_1 = arith.constant 0 : i32
    return %c0_i32, %c0_i32_0 : i32, i32
  }
  func.func @transform_16(%arg0: i32) -> (i32, i32) {
    %c0_i32 = arith.constant 0 : i32
    %c0_i32_0 = arith.constant 0 : i32
    return %arg0, %c0_i32 : i32, i32
  }
}

</mosaic_0001>

<bundles_post_ra>
// kernel: tpu_custom_call.1
= control target key start
LH: loop header
LB: loop body
LE: loop exit
PB: predicated region body
PF: predicated region fallthrough
CT: control target
= control target key end

     0   :  { %s1256_s0 = inlined_call_operand.vmem [shape: f32[16,96], index: 0, kind: input, shape index: {}]   ;;  %s1257_s1 = inlined_call_operand.vmem [shape: f32[16,96], index: 1, kind: input, shape index: {}]   ;;  %s1258_s2 = inlined_call_operand.vmem [shape: f32[96,32], index: 2, kind: input, shape index: {}]   ;;  %s1259_s3 = inlined_call_operand.vmem [shape: f32[1,32], index: 3, kind: input, shape index: {}]   ;;  %s1260_s4 = inlined_call_operand.vmem [shape: f32[96,32], index: 4, kind: input, shape index: {}]   ;;  %s1261_s5 = inlined_call_operand.vmem [shape: f32[1,32], index: 5, kind: input, shape index: {}]   ;;  %s1262_s6 = inlined_call_operand.vmem [shape: f32[1,32], index: 6, kind: input, shape index: {}]   ;;  %s1263_s7 = inlined_call_operand.vmem [shape: f32[1,32], index: 7, kind: input, shape index: {}]   ;;  %s1264_s8 = inlined_call_operand.vmem [shape: f32[1,32], index: 8, kind: input, shape index: {}]   ;;  %s1265_s9 = inlined_call_operand.vmem [shape: f32[1,32], index: 9, kind: input, shape index: {}]   ;;  %s1266_s10 = inlined_call_operand.vmem [shape: f32[1,32], index: 10, kind: input, shape index: {}]   ;;  %s1267_s11 = inlined_call_operand.vmem [shape: f32[1,32], index: 11, kind: input, shape index: {}]   ;;  %s1268_s12 = inlined_call_operand.vmem [shape: f32[32,128], index: 12, kind: input, shape index: {}]   ;;  %s1269_s13 = inlined_call_operand.vmem [shape: f32[32,128], index: 13, kind: input, shape index: {}]   ;;  %s1270_s14 = inlined_call_operand.vmem [shape: f32[32,128], index: 14, kind: input, shape index: {}]   ;;  %s1271_s15 = inlined_call_operand.vmem [shape: f32[1,128], index: 15, kind: input, shape index: {}]   ;;  %s1272_s16 = inlined_call_operand.hbm [shape: f32[16,128], index: 16, kind: output, shape index: {}]  }
   0x1   :  { %1274 = sst [smem:[#allocation5_spill]] %s1256_s0 }
   0x2   :  { %v56_v0 = vld [vmem:[%s1258_s2] sm:$0xff]  ;;  %v57_v1 = vld [vmem:[%s1258_s2 + $0x8] sm:$0xff]  ;;  %v58_v5 = vld [vmem:[%s1258_s2 + $0x10] sm:$0xff]  ;;  %vm75_vm0 = vcmask 785408   ;;  %s1275_s25 = sld [smem:[#allocation5_spill]] }
   0x3   :  { %v169_v2 = vld [vmem:[%s1260_s4] sm:$0xff]  ;;  %v842_v3 = vpack.c.bf16 %v57_v1, %v56_v0  ;;  %v170_v4 = vld [vmem:[%s1260_s4 + $0x8] sm:$0xff]  ;;  %v59_v6 = vld [vmem:[%s1258_s2 + $0x18] sm:$0xff] }
   0x4   :  { %v866_v7 = vpack.c.bf16 %v170_v4, %v169_v2  ;;  %v846_v8 = vpack.c.bf16 %v59_v6, %v58_v5  ;;  %v171_v9 = vld [vmem:[%s1260_s4 + $0x10] sm:$0xff]  ;;  %v172_v10 = vld [vmem:[%s1260_s4 + $0x18] sm:$0xff]  ;;  %v60_v11 = vld [vmem:[%s1258_s2 + $0x20] sm:$0xff] }
   0x5   :  { %843 = vmatprep.subr.bf16.mxu0 %v842_v3  ;;  %v870_v12 = vpack.c.bf16 %v172_v10, %v171_v9  ;;  %v61_v13 = vld [vmem:[%s1258_s2 + $0x28] sm:$0xff]  ;;  %v173_v14 = vld [vmem:[%s1260_s4 + $0x20] sm:$0xff]  ;;  %v62_v18 = vld [vmem:[%s1258_s2 + $0x30] sm:$0xff] }
   0x6   :  { %v174_v15 = vld [vmem:[%s1260_s4 + $0x28] sm:$0xff]  ;;  %867 = vmatprep.subr.bf16.mxu1 %v866_v7  ;;  %845 = vmatpush3.bf16.msra.mxu0 %v842_v3  ;;  %v850_v16 = vpack.c.bf16 %v61_v13, %v60_v11  ;;  %v63_v19 = vld [vmem:[%s1258_s2 + $0x38] sm:$0xff]  ;;  %v175_v20 = vld [vmem:[%s1260_s4 + $0x30] sm:$0xff] }
   0x7   :  { %869 = vmatpush3.bf16.msra.mxu1 %v866_v7  ;;  %847 = vmatprep.subr.bf16.mxu0 %v846_v8  ;;  %v874_v17 = vpack.c.bf16 %v174_v15, %v173_v14  ;;  %v176_v21 = vld [vmem:[%s1260_s4 + $0x38] sm:$0xff]  ;;  %v167_v23 = vld [vmem:[%s1257_s1] sm:$0xff]  ;;  %v854_v24 = vpack.c.bf16 %v63_v19, %v62_v18 }
   0x8   :  { %871 = vmatprep.subr.bf16.mxu1 %v870_v12  ;;  %v54_v22 = vld [vmem:[%s1275_s25] sm:$0xff] }
   0xa   :  { %849 = vmatpush3.bf16.msra.mxu0 %v846_v8 }
   0xb   :  { %873 = vmatpush3.bf16.msra.mxu1 %v870_v12  ;;  %851 = vmatprep.subr.bf16.mxu0 %v850_v16 }
   0xc   :  { %21 = vsyncpa [#allocation3], 0  ;;  %875 = vmatprep.subr.bf16.mxu1 %v874_v17  ;;  %v878_v25 = vpack.c.bf16 %v176_v21, %v175_v20  ;;  %v64_v26 = vld [vmem:[%s1258_s2 + $0x40] sm:$0xff]  ;;  %v65_v27 = vld [vmem:[%s1258_s2 + $0x48] sm:$0xff]  ;;  %779 = vmatprep.mubr.msk.f32.mxu0 %vm75_vm0, %v54_v22  ;;  %vm281_vm1 = vcmask 261120  }
   0xd   :  { %v177_v28 = vld [vmem:[%s1260_s4 + $0x40] sm:$0xff]  ;;  %v178_v29 = vld [vmem:[%s1260_s4 + $0x48] sm:$0xff]  ;;  %806 = vmatprep.mubr.msk.f32.mxu1 %vm75_vm0, %v167_v23  ;;  %v858_v30 = vpack.c.bf16 %v65_v27, %v64_v26  ;;  %v66_v32 = vld [vmem:[%s1258_s2 + $0x50] sm:$0xff] }
   0xe   :  { %853 = vmatpush3.bf16.msra.mxu0 %v850_v16  ;;  %v882_v31 = vpack.c.bf16 %v178_v29, %v177_v28  ;;  %v67_v33 = vld [vmem:[%s1258_s2 + $0x58] sm:$0xff]  ;;  %v179_v34 = vld [vmem:[%s1260_s4 + $0x50] sm:$0xff]  ;;  %v55_v38 = vld [vmem:[%s1275_s25 + $0x8] sm:$0xff] }
   0xf   :  { %877 = vmatpush3.bf16.msra.mxu1 %v874_v17  ;;  %855 = vmatprep.subr.bf16.mxu0 %v854_v24  ;;  %v180_v35 = vld [vmem:[%s1260_s4 + $0x58] sm:$0xff]  ;;  %v862_v36 = vpack.c.bf16 %v67_v33, %v66_v32  ;;  %v168_v39 = vld [vmem:[%s1257_s1 + $0x8] sm:$0xff]  ;;  %v690_v40 = vld [vmem:[%s1259_s3] ss:$0 sm:$0xff] }
  0x10   :  { %879 = vmatprep.subr.bf16.mxu1 %v878_v25  ;;  %v886_v37 = vpack.c.bf16 %v180_v35, %v179_v34  ;;  %v693_v41 = vld [vmem:[%s1261_s5] ss:$0 sm:$0xff] }
  0x12   :  { %857 = vmatpush3.bf16.msra.mxu0 %v854_v24 }
  0x13   :  { %881 = vmatpush3.bf16.msra.mxu1 %v878_v25  ;;  %859 = vmatprep.subr.bf16.mxu0 %v858_v30 }
  0x14   :  { %883 = vmatprep.subr.bf16.mxu1 %v882_v31 }
  0x16   :  { %861 = vmatpush3.bf16.msra.mxu0 %v858_v30 }
  0x17   :  { %885 = vmatpush3.bf16.msra.mxu1 %v882_v31  ;;  %863 = vmatprep.subr.bf16.mxu0 %v862_v36 }
  0x18   :  { %887 = vmatprep.subr.bf16.mxu1 %v886_v37 }
  0x1a   :  { %865 = vmatpush3.bf16.msra.mxu0 %v862_v36 }
  0x1b   :  { %889 = vmatpush3.bf16.msra.mxu1 %v886_v37 }
  0x1d   :  { %780 = vmatmul.mubr.msk.f32.vlgmr.msra.gmra.mrb[0].mxu0 %vm75_vm0, %v55_v38 }
  0x1e   :  { %807 = vmatmul.mubr.msk.f32.vlgmr.msra.gmra.mrb[0].mxu1 %vm75_vm0, %v168_v39 }
  0xf0   :  { %v781_v42 = vpop.f32.mrb[0].mxu0 }
  0xf1   :  { %v154_v43 = vadd.f32 %v781_v42, %v690_v40  ;;  %v808_v44 = vpop.f32.mrb[0].mxu1  ;;  %v148_v45 = vpop.f32.mrb[1].mxu0 }
  0xf2   :  { %v266_v46 = vadd.f32 %v808_v44, %v693_v41  ;;  %v149_v47 = vadd.f32 %v690_v40, %v148_v45  ;;  %v260_v48 = vpop.f32.mrb[1].mxu1  ;;  %v406_v44 = vld [vmem:[%s1268_s12] sm:$0xff]  ;;  %v407_v45 = vld [vmem:[%s1268_s12 + $0x8] sm:$0xff] }
  0xf3   :  { %v160_v49 = vmul.f32 0.70710677, %v154_v43  ;;  %v261_v50 = vadd.f32 %v693_v41, %v260_v48  ;;  %v158_v56 = vmul.f32 0.5, %v154_v43  ;;  %v411_v48 = vld [vmem:[%s1269_s13 + $0x8] sm:$0xff] }
  0xf4   :  { %v272_v51 = vmul.f32 0.70710677, %v266_v46  ;;  %v159_v52 = vmul.f32 0.70710677, %v149_v47  ;;  %v270_v61 = vmul.f32 0.5, %v266_v46  ;;  %v157_v62 = vmul.f32 0.5, %v149_v47 }
  0xf5   :  { %921 = verf.f32 %v160_v49  ;;  %v271_v53 = vmul.f32 0.70710677, %v261_v50  ;;  %v269_v3 = vmul.f32 0.5, %v261_v50  ;;  %v410_v46 = vld [vmem:[%s1269_s13] sm:$0xff]  ;;  %v898_v47 = vpack.c.bf16 %v407_v45, %v406_v44  ;;  %v408_v49 = vld [vmem:[%s1268_s12 + $0x10] sm:$0xff]  ;;  %v409_v50 = vld [vmem:[%s1268_s12 + $0x18] sm:$0xff] }
  0xf6   :  { %923 = verf.f32 %v272_v51  ;;  %v890_v51 = vpack.c.bf16 %v411_v48, %v410_v46 }
  0xf7   :  { %925 = verf.f32 %v159_v52  ;;  %v902_v52 = vpack.c.bf16 %v409_v50, %v408_v49  ;;  %899 = vmatprep.subr.bf16.mxu0 %v898_v47 }
  0xf8   :  { %927 = verf.f32 %v271_v53  ;;  %v412_v53 = vld [vmem:[%s1269_s13 + $0x10] sm:$0xff]  ;;  %891 = vmatprep.subr.bf16.mxu1 %v890_v51  ;;  %901 = vmatpush3.bf16.msra.mxu0 %v898_v47 }
  0xf9   :  { %893 = vmatpush3.bf16.msra.mxu1 %v890_v51  ;;  %903 = vmatprep.subr.bf16.mxu0 %v902_v52 }
  0xfc   :  { %905 = vmatpush3.bf16.msra.mxu0 %v902_v52 }
  0xff   :  { %v922_v54 = vpop.eup %921 }
 0x100   :  { %v924_v55 = vpop.eup %923  ;;  %v164_v57 = vadd.f32 1.0, %v922_v54  ;;  %v413_v54 = vld [vmem:[%s1269_s13 + $0x18] sm:$0xff] }
 0x101   :  { %v926_v58 = vpop.eup %925  ;;  %v276_v59 = vadd.f32 1.0, %v924_v55  ;;  %v894_v55 = vpack.c.bf16 %v413_v54, %v412_v53 }
 0x102   :  { %v928_v60 = vpop.eup %927  ;;  %v163_v63 = vadd.f32 1.0, %v926_v58  ;;  %v166_v0 = vmul.f32 %v164_v57, %v158_v56  ;;  %v576_v56 = vld [vmem:[%s1270_s14] sm:$0xff]  ;;  %v577_v57 = vld [vmem:[%s1270_s14 + $0x8] sm:$0xff] }
 0x103   :  { %v275_v1 = vadd.f32 1.0, %v928_v60  ;;  %v278_v2 = vmul.f32 %v276_v59, %v270_v61  ;;  %895 = vmatprep.subr.bf16.mxu1 %v894_v55  ;;  %v906_v58 = vpack.c.bf16 %v577_v57, %v576_v56 }
 0x104   :  { %v285_v4 = vsel %vm281_vm1, %v166_v0, 0.0  ;;  %v165_v5 = vmul.f32 %v163_v63, %v157_v62  ;;  %897 = vmatpush3.bf16.msra.mxu1 %v894_v55 }
 0x105   :  { %286 = vadd.xlane.f32.xlu1 %v285_v4  ;;  %v277_v6 = vmul.f32 %v275_v1, %v269_v3  ;;  %v291_v8 = vsel %vm281_vm1, %v278_v2, 0.0  ;;  %v280_v9 = vmul.f32 %v278_v2, %v166_v0  ;;  %907 = vmatprep.subr.bf16.mxu0 %v906_v58 }
 0x106   :  { %v282_v7 = vsel %vm281_vm1, %v165_v5, 0.0 }
 0x107   :  { %283 = vadd.xlane.f32.xlu0 %v282_v7  ;;  %v288_v10 = vsel %vm281_vm1, %v277_v6, 0.0  ;;  %v279_v11 = vmul.f32 %v277_v6, %v165_v5  ;;  %v299_v12 = vsel %vm281_vm1, %v280_v9, 0.0 }
 0x109   :  { %292 = vadd.xlane.f32.xlu1 %v291_v8  ;;  %v296_v13 = vsel %vm281_vm1, %v279_v11, 0.0 }
 0x10b   :  { %289 = vadd.xlane.f32.xlu0 %v288_v10  ;;  %v698_v10 = vld [vmem:[%s1263_s7] ss:$0 sm:$0xff] }
 0x10d   :  { %300 = vadd.xlane.f32.xlu1 %v299_v12 }
 0x10f   :  { %297 = vadd.xlane.f32.xlu0 %v296_v13 }
 0x192   :  { %v287_v14 = vpop.xlane.xlu1 %286 }
 0x194   :  { %v284_v15 = vpop.xlane.xlu0 %283 }
 0x196   :  { %v293_v16 = vpop.xlane.xlu1 %292 }
 0x197   :  { %v295_v18 = vadd.f32 %v293_v16, %v287_v14 }
 0x198   :  { %v290_v17 = vpop.xlane.xlu0 %289 }
 0x199   :  { %v294_v20 = vadd.f32 %v290_v17, %v284_v15  ;;  %v700_v15 = vld [vmem:[%s1264_s8] ss:$0 sm:$0xff] }
 0x19a   :  { %v301_v19 = vpop.xlane.xlu1 %300  ;;  %v699_v17 = vld [vmem:[%s1266_s10] ss:$0 sm:$0xff] }
 0x19b   :  { %v303_v21 = vadd.f32 %v301_v19, %v295_v18  ;;  %v697_v19 = vld [vmem:[%s1265_s9] ss:$0 sm:$0xff] }
 0x19c   :  { %v298_v22 = vpop.xlane.xlu0 %297 }
 0x19d   :  { %v305_v23 = vmul.f32 0.010416667, %v303_v21  ;;  %v302_v24 = vadd.f32 %v298_v22, %v294_v20 }
 0x19f   :  { %v304_v25 = vmul.f32 0.010416667, %v302_v24  ;;  %v1145_v26 = vsub.f32 %v278_v2, %v305_v23  ;;  %v1147_v27 = vsub.f32 %v166_v0, %v305_v23  ;;  %v1157_v32 = vsub.f32 %v280_v9, %v305_v23 }
 0x1a1   :  { %v321_v28 = vmul.f32 %v1145_v26, %v1145_v26  ;;  %v313_v29 = vmul.f32 %v1147_v27, %v1147_v27  ;;  %v1153_v30 = vsub.f32 %v277_v6, %v304_v25  ;;  %v1155_v31 = vsub.f32 %v165_v5, %v304_v25 }
 0x1a2   :  { %v1159_v33 = vsub.f32 %v279_v11, %v304_v25  ;;  %v331_v40 = vmul.f32 %v1157_v32, %v1157_v32  ;;  %v696_v11 = vld [vmem:[%s1262_s6] ss:$0 sm:$0xff] }
 0x1a3   :  { %v325_v34 = vsel %vm281_vm1, %v321_v28, 0.0  ;;  %v317_v35 = vsel %vm281_vm1, %v313_v29, 0.0  ;;  %v320_v36 = vmul.f32 %v1153_v30, %v1153_v30  ;;  %v312_v37 = vmul.f32 %v1155_v31, %v1155_v31 }
 0x1a4   :  { %326 = vadd.xlane.f32.xlu1 %v325_v34  ;;  %318 = vadd.xlane.f32.xlu0 %v317_v35  ;;  %v330_v41 = vmul.f32 %v1159_v33, %v1159_v33  ;;  %v335_v42 = vsel %vm281_vm1, %v331_v40, 0.0 }
 0x1a5   :  { %v322_v38 = vsel %vm281_vm1, %v320_v36, 0.0  ;;  %v314_v39 = vsel %vm281_vm1, %v312_v37, 0.0 }
 0x1a6   :  { %v332_v43 = vsel %vm281_vm1, %v330_v41, 0.0  ;;  %v708_v41 = vld [vmem:[%s1271_s15] ss:$0 sm:$0xff] }
 0x1a8   :  { %323 = vadd.xlane.f32.xlu1 %v322_v38  ;;  %315 = vadd.xlane.f32.xlu0 %v314_v39 }
 0x1ac   :  { %336 = vadd.xlane.f32.xlu1 %v335_v42  ;;  %333 = vadd.xlane.f32.xlu0 %v332_v43 }
 0x231   :  { %v327_v59 = vpop.xlane.xlu1 %326  ;;  %v319_v60 = vpop.xlane.xlu0 %318 }
 0x232   :  { %v329_v63 = vadd.f32 %v327_v59, %v319_v60 }
 0x235   :  { %v324_v61 = vpop.xlane.xlu1 %323  ;;  %v316_v62 = vpop.xlane.xlu0 %315 }
 0x236   :  { %v328_v0 = vadd.f32 %v324_v61, %v316_v62 }
 0x239   :  { %v337_v1 = vpop.xlane.xlu1 %336  ;;  %v334_v2 = vpop.xlane.xlu0 %333 }
 0x23a   :  { %v339_v3 = vadd.f32 %v337_v1, %v329_v63  ;;  %v338_v4 = vadd.f32 %v334_v2, %v328_v0 }
 0x23c   :  { %v341_v5 = vmul.f32 0.010416667, %v339_v3  ;;  %v340_v6 = vmul.f32 0.010416667, %v338_v4 }
 0x23e   :  { %v343_v7 = vadd.f32 1e-12, %v341_v5  ;;  %v342_v8 = vadd.f32 1e-12, %v340_v6 }
 0x240   :  { %929 = vrsqrt.f32 %v343_v7 }
 0x241   :  { %931 = vrsqrt.f32 %v342_v8 }
 0x24a   :  { %v930_v9 = vpop.eup %929 }
 0x24b   :  { %v932_v12 = vpop.eup %931  ;;  %v367_v13 = vmul.f32 %v930_v9, %v1145_v26  ;;  %v347_v14 = vmul.f32 %v930_v9, %v1147_v27  ;;  %v578_v26 = vld [vmem:[%s1270_s14 + $0x10] sm:$0xff]  ;;  %v579_v27 = vld [vmem:[%s1270_s14 + $0x18] sm:$0xff]  ;;  %v387_v34 = vmul.f32 %v930_v9, %v1157_v32  ;;  %s957_s14 = smov [#allocation2]  }
 0x24c   :  { %v366_v16 = vmul.f32 %v932_v12, %v1153_v30  ;;  %v346_v18 = vmul.f32 %v932_v12, %v1155_v31  ;;  %v386_v20 = vmul.f32 %v932_v12, %v1159_v33  ;;  %v701_v30 = vld [vmem:[%s1267_s11] ss:$0 sm:$0xff]  ;;  %v910_v35 = vpack.c.bf16 %v579_v27, %v578_v26  ;;  %s679_s28 = sshll.u32 %s957_s14, 4  ;;  %s680_s28 = int_to_ptr.vmem [resolvable:$true] %s679_s28 }
 0x24d   :  { %v376_v21 = vmul.f32 %v698_v10, %v367_v13  ;;  %v356_v22 = vmul.f32 %v696_v11, %v347_v14  ;;  %v396_v37 = vmul.f32 %v700_v15, %v387_v34  ;;  %s933_s29 = scalar_lea.vmem %s680_s28, 256  ;;  %p938_p1 = scmp.lt.s32.totalorder %s680_s28, %s680_s28 }
 0x24e   :  { %v375_v23 = vmul.f32 %v698_v10, %v366_v16  ;;  %v355_v24 = vmul.f32 %v696_v11, %v346_v18  ;;  %v395_v25 = vmul.f32 %v700_v15, %v386_v20  ;;  %p934_p0 = scmp.ne.s32.totalorder %s680_s28, %s933_s29  ;;  %p939_p2 = scmp.lt.s32.totalorder %s933_s29, %s933_s29 }
 0x24f   :  { %v385_v28 = vadd.f32 %v699_v17, %v376_v21  ;;  %v365_v29 = vadd.f32 %v697_v19, %v356_v22  ;;  %v405_v38 = vadd.f32 %v701_v30, %v396_v37 }
 0x250   :  { %v384_v31 = vadd.f32 %v699_v17, %v375_v23  ;;  %v364_v33 = vadd.f32 %v697_v19, %v355_v24  ;;  %v404_v36 = vadd.f32 %v701_v30, %v395_v25  ;;  %p940_p3 = por %p939_p2, %p938_p1 }
 0x252   :  { %817 = vmatprep.mubr.msk.f32.mxu1 %vm281_vm1, %v384_v31  ;;  %828 = vmatprep.mubr.msk.f32.mxu0 %vm281_vm1, %v364_v33  ;;  %p941_p4 = pnand %p940_p3, %p934_p0 }
 0x253   :  { %818 = vmatmul.mubr.msk.f32.vlgmr.msra.gmra.mrb[2].mxu1 %vm281_vm1, %v385_v28  ;;  %829 = vmatmul.mubr.msk.f32.vlgmr.msra.gmra.mrb[2].mxu0 %vm281_vm1, %v365_v29 }
 0x254   :  { %909 = vmatpush3.bf16.msra.mxu0 %v906_v58  ;;  %839 = vmatprep.mubr.msk.f32.mxu0 %vm281_vm1, %v404_v36 }
 0x255   :  { %911 = vmatprep.subr.bf16.mxu0 %v910_v35 }
 0x258   :  { %913 = vmatpush3.bf16.msra.mxu0 %v910_v35 }
 0x25b   :  { %840 = vmatmul.mubr.msk.f32.vlgmr.msra.gmra.mrb[2].mxu0 %vm281_vm1, %v405_v38 }
 0x326   :  { %v819_v32 = vpop.f32.mrb[2].mxu1 }
 0x327   :  { %v486_v39 = vpop.f32.mrb[3].mxu1 }
 0x32e   :  { %v841_v40 = vpop.f32.mrb[2].mxu0 }
 0x32f   :  { %v914_v42 = vadd.f32 %v841_v40, %v819_v32  ;;  %v652_v43 = vpop.f32.mrb[3].mxu0 }
 0x330   :  { %v915_v44 = vadd.f32 %v652_v43, %v486_v39 }
 0x331   :  { %v671_v45 = vadd.f32 %v914_v42, %v708_v41 }
 0x332   :  { %v670_v46 = vadd.f32 %v915_v44, %v708_v41 }
 0x333   :  { %673 = vst [vmem:[#allocation2 + $0x8] sm:$0xff] %v671_v45 }
 0x334   :  { %672 = vst [vmem:[#allocation2] sm:$0xff] %v670_v46 }
 0x335   :  { %944 = shalt.err (!%p941_p4)
}
 0x336   :  { %s945_s15 = scalar_lea.hbm %s1272_s16, 256 }
 0x337   :  { %p946_p5 = scmp.ne.s32.totalorder %s1272_s16, %s945_s15  ;;  %p949_p6 = scmp.lt.u32.totalorder %s945_s15, %s1272_s16 }
 0x339   :  { %p951_p7 = pnand %p949_p6, %p946_p5 }
 0x33b   :  { %954 = shalt.err (!%p951_p7)
}
 0x33c   :  { %s958_s18 = smov 128   ;;  %s959_s19 = smov 8  }
 0x33d   :  { %685 = dma.vmem_to_hbm [thread:$0]  %s680_s28, 256, %s1272_s16, [#allocation3], %s958_s18, %s958_s18, %s959_s19  }
 0x33e   :  { %955 = dma.done.wait [#allocation3], 256  }
 0x33f   :  { %956 = vsyncadd [#allocation3], 4294967040 }
 0x340   :  { %689 = vsyncpa [#allocation3], 1 }

</bundles_post_ra>
